<compile_context>
chip_gen: v7x
topology: tpu7x:2x2x1
jax: 0.10.0
libtpu: 0.0.40
codegen_flags: <defaults>
</compile_context>

<pallas_src>
from collections import defaultdict

import jax
import jax.numpy as jnp
import numpy as np
from jax.experimental import pallas as pl
from jax.experimental.pallas import tpu as pltpu


# ----------------------------- fused Pallas kernel ---------------------------


def _make_fused_lightgcn_kernel(num_layers, concat):
    """Whole 4-view, num_layers LightGCN stack + layer-mean in one kernel body.

        acc = init_mask * x0
        x_l = view_mask * relu(A @ x_{l-1})        (A, rhs in bf16; acc in f32)
        out = inv_count * (acc + sum_l x_l)        (concat=True layer mean)
    """

    def kernel(a_ref, x0_ref, vmask_ref, scales_ref, o_ref):
        a = a_ref[...]                      # (N, N) bf16 shared normalized adjacency
        x = x0_ref[...]                     # (N, H) f32, 4 views lane-packed
        vmask = vmask_ref[...]              # (N, H) f32 per-(row, view-lane) mask
        scales = scales_ref[...]            # (N, 2) f32: [:,0]=init_mask, [:,1]=inv_count
        init_m = scales[:, 0:1]
        inv_c = scales[:, 1:2]

        acc = x * init_m                    # init emb joins the mean only for spot/user rows
        for _ in range(num_layers):         # static unroll (num_layers = 2)
            # 1/div[dst] and 1/sqrt(deg_s*deg_t) are folded into `a`; bf16 MXU
            # dot with f32 accumulate, then relu + view mask (cheap VPU work).
            y = jnp.dot(a, x.astype(jnp.bfloat16),
                        preferred_element_type=jnp.float32)
            x = jnp.maximum(y, 0.0) * vmask
            acc = acc + x
        if concat:
            o_ref[...] = acc * inv_c        # fused layer-mean
        else:
            o_ref[...] = x

    return kernel


def lightgcn_forward(a_big, x0, view_mask, scales, *, num_layers, concat):
    """Single pallas_call for the whole forward.  All operands fit one VMEM tile."""
    n = a_big.shape[0]
    h = x0.shape[1]
    a_bytes = n * n * 2                                   # bf16 adjacency
    io_bytes = a_bytes + (2 * n * h + n * 2 + n * h) * 4  # x0 + vmask + scales + out (f32)
    flops = 2 * num_layers * n * n * h
    return pl.pallas_call(
        _make_fused_lightgcn_kernel(num_layers, concat),
        out_shape=jax.ShapeDtypeStruct((n, h), jnp.float32),
        grid=(1,),
        in_specs=[
            pl.BlockSpec((n, n), lambda i: (0, 0)),   # A (bf16, shared across views)
            pl.BlockSpec((n, h), lambda i: (0, 0)),   # X0 slab (views lane-packed)
            pl.BlockSpec((n, h), lambda i: (0, 0)),   # per-(row, view-lane) mask
            pl.BlockSpec((n, 2), lambda i: (0, 0)),   # [init_mask, inv_count] per row
        ],
        out_specs=pl.BlockSpec((n, h), lambda i: (0, 0)),
        compiler_params=pltpu.CompilerParams(
            dimension_semantics=("arbitrary",),
            vmem_limit_bytes=48 * 1024 * 1024),
        cost_estimate=pl.CostEstimate(
            flops=flops, transcendentals=0, bytes_accessed=io_bytes),
    )(a_big, x0, view_mask, scales)


# --------------------------------- main ---------------------------------------

if __name__ == "__main__":
    key = jax.random.PRNGKey(0)

    # config (config['model'] equivalents)
    hidden = 8
    num_layers = 2
    concat = True
    relu_flag = True   # conv already applies relu unconditionally; 2nd relu is a no-op

    # synthetic hetero-graph sizes
    n_spot, n_user, n_category, n_city, n_pref = 12, 10, 5, 6, 4
    # row counts of the feature matrices actually used in forward
    # (reproduces the original quirk: city_emb3/4 use num_embeddings = n_user)
    rows = {"spot": n_spot, "user": n_user, "category": n_category,
            "city": n_user, "pref": n_pref}
    node_types = ["spot", "user", "category", "city", "pref"]

    # ---- synthetic edge_index_dict (full graph), (2, E) int32 ---------------
    def rand_edges(k, n_src, n_dst, n_e):
        k1, k2 = jax.random.split(k)
        s = jax.random.randint(k1, (n_e,), 0, n_src, dtype=jnp.int32)
        t = jax.random.randint(k2, (n_e,), 0, n_dst, dtype=jnp.int32)
        return jnp.stack([s, t])

    key, k0, k1, k2, k3 = jax.random.split(key, 5)
    e_us = rand_edges(k0, n_user, n_spot, 24)
    e_sc = rand_edges(k1, n_spot, n_category, 12)
    e_uc = rand_edges(k2, n_user, n_city, 10)
    e_cp = rand_edges(k3, n_city, n_pref, 6)

    edge_index_dict = {
        ("user", "to", "spot"): e_us,
        ("spot", "rev_to", "user"): jnp.flip(e_us, axis=0),
        ("spot", "to", "category"): e_sc,
        ("category", "rev_to", "spot"): jnp.flip(e_sc, axis=0),
        ("user", "to", "city"): e_uc,
        ("city", "rev_to", "user"): jnp.flip(e_uc, axis=0),
        ("city", "to", "pref"): e_cp,
        ("pref", "rev_to", "city"): jnp.flip(e_cp, axis=0),
    }

    # div: number of edge types targeting each node type, computed on the FULL
    # dict exactly as HeteroGCNLightConv.__init__ does (view-independent).
    div_full = defaultdict(int)
    for k in edge_index_dict:
        div_full[k[-1]] += 1

    node_type_dict = {
        1: ["spot", "user"],
        2: ["spot", "user", "category"],
        3: ["spot", "user", "city", "pref"],
        4: ["spot", "user", "city", "pref", "category"],
    }
    edge_keys_per_view = {
        v: [k for k in edge_index_dict
            if k[0] in node_type_dict[v] and k[-1] in node_type_dict[v]]
        for v in (1, 2, 3, 4)
    }

    # ---- embeddings, normal_(std=0.1), deterministic --------------------------
    def emb(k, n, d):
        return 0.1 * jax.random.normal(k, (n, d), dtype=jnp.float32)

    key, *ks = jax.random.split(key, 15)
    x_init = {
        1: {"spot": emb(ks[0], n_spot, hidden), "user": emb(ks[1], n_user, hidden)},
        2: {"spot": emb(ks[2], n_spot, hidden), "user": emb(ks[3], n_user, hidden),
            "category": emb(ks[4], n_category, hidden)},
        3: {"spot": emb(ks[5], n_spot, hidden), "user": emb(ks[6], n_user, hidden),
            "city": emb(ks[7], n_user, hidden),   # quirk: sized by n_user
            "pref": emb(ks[8], n_pref, hidden)},
        4: {"spot": emb(ks[9], n_spot, hidden), "user": emb(ks[10], n_user, hidden),
            "city": emb(ks[11], n_user, hidden),  # quirk: sized by n_user
            "pref": emb(ks[12], n_pref, hidden),
            "category": emb(ks[13], n_category, hidden)},
    }

    # ---- one-time host-side packing (numpy) -----------------------------------
    # Row layout: ONE copy of each node type (shared by all views).
    row_off, off = {}, 0
    for nt in node_types:
        row_off[nt] = off
        off += rows[nt]
    n_total = off

    def round_up(v, m):
        return ((v + m - 1) // m) * m

    n_pad = max(128, round_up(n_total, 128))   # lane/sublane aligned row count
    h_pad = 128                                # lane-dense feature axis (4 views * 8 -> 32, pad to 128)

    # Shared block-structured normalized adjacency over ALL edge types, with
    # 1/div[dst] and 1/sqrt(deg_s*deg_t) folded in.  Built once over the full
    # graph: the per-view restriction is handled by the lane-packed view mask,
    # not by duplicating A.  Stored in bf16 (fp8 on v7x: see TODO above).
    a_np = np.zeros((n_pad, n_pad), np.float32)
    for k, e in edge_index_dict.items():
        src, dst = k[0], k[-1]
        e = np.asarray(e)
        s, t = e[0], e[1]
        deg_s = np.bincount(s, minlength=rows[src]).astype(np.float32)[s]
        deg_t = np.bincount(t, minlength=rows[dst]).astype(np.float32)[t]
        val = 1.0 / (np.sqrt(deg_s * deg_t) * float(div_full[dst]))
        np.add.at(a_np, (row_off[dst] + t, row_off[src] + s), val)

    # X0 slab with the 4 views packed along lanes; per-(row, view-lane) mask.
    x0_np = np.zeros((n_pad, h_pad), np.float32)
    vmask_np = np.zeros((n_pad, h_pad), np.float32)
    for view in (1, 2, 3, 4):
        lo = (view - 1) * hidden
        for nt in node_type_dict[view]:
            o = row_off[nt]
            x0_np[o:o + rows[nt], lo:lo + hidden] = np.asarray(x_init[view][nt])
            vmask_np[o:o + rows[nt], lo:lo + hidden] = 1.0

    # Per-row [init_mask, inv_count] (merged into one (N, 2) input).
    scales_np = np.zeros((n_pad, 2), np.float32)
    for nt in node_types:
        o = row_off[nt]
        if nt in ("spot", "user"):            # module appends init emb only for these
            scales_np[o:o + rows[nt], 0] = 1.0
            scales_np[o:o + rows[nt], 1] = 1.0 / (num_layers + 1)
        else:
            scales_np[o:o + rows[nt], 1] = 1.0 / num_layers

    a_big = jnp.asarray(a_np, dtype=jnp.bfloat16)   # bf16 adjacency (dominant byte stream)
    x0 = jnp.asarray(x0_np)
    view_mask = jnp.asarray(vmask_np)
    scales = jnp.asarray(scales_np)

    # ---- Pallas: whole forward in one kernel launch ---------------------------
    slab = lightgcn_forward(a_big, x0, view_mask, scales,
                            num_layers=num_layers, concat=concat)
    jax.block_until_ready(slab)

    # cheap JAX glue: per-node-type row slice + cross-view lane slice/concat
    out_pallas = {}
    for view in (1, 2, 3, 4):
        lo = (view - 1) * hidden
        for nt in node_type_dict[view]:
            o = row_off[nt]
            v = slab[o:o + rows[nt], lo:lo + hidden]
            out_pallas[nt] = v if nt not in out_pallas else jnp.concatenate(
                [out_pallas[nt], v], axis=1)

    # ---- pure-JAX scatter reference (follows the PyTorch module exactly, f32) -
    def conv_ref(x_dict, edge_keys):
        out = {}
        for k in edge_keys:
            src, dst = k[0], k[-1]
            e = edge_index_dict[k]
            s_idx, t_idx = e[0], e[1]
            deg_s = jnp.zeros((rows[src],), jnp.float32).at[s_idx].add(1.0)[s_idx]
            deg_t = jnp.zeros((rows[dst],), jnp.float32).at[t_idx].add(1.0)[t_idx]
            norm = jnp.sqrt(deg_s * deg_t)                       # div_all['s__r__t']
            msg = x_dict[src][s_idx] / norm[:, None]
            agg = jnp.zeros((rows[dst], hidden), jnp.float32).at[t_idx].add(msg)
            out[dst] = out[dst] + agg if dst in out else agg
        out = {kk: jnp.maximum(vv / div_full[kk], 0.0) for kk, vv in out.items()}
        if relu_flag:
            out = {kk: jnp.maximum(vv, 0.0) for kk, vv in out.items()}
        return out

    def run_view_ref(view):
        x = dict(x_init[view])
        x_all = {nt: [] for nt in node_type_dict[view]}
        x_all["spot"].append(x_init[view]["spot"])
        x_all["user"].append(x_init[view]["user"])
        for _ in range(num_layers):
            x = conv_ref(x, edge_keys_per_view[view])
            if not concat:
                continue
            for nt in x:
                x_all[nt].append(x[nt])
        if concat:
            x = {nt: jnp.mean(jnp.stack(v, axis=1), axis=1) for nt, v in x_all.items()}
        return x

    out_ref = {}
    for view in (1, 2, 3, 4):
        xv = run_view_ref(view)
        for kk, vv in xv.items():
            out_ref[kk] = vv if kk not in out_ref else jnp.concatenate(
                [out_ref[kk], vv], axis=1)

    # bf16 adjacency / dot operands vs. f32 reference => loosened tolerances.
    for kk in out_ref:
        np.testing.assert_allclose(
            np.asarray(out_pallas[kk]), np.asarray(out_ref[kk]),
            rtol=2e-2, atol=2e-3)

    print("KERNEL_OK")
</pallas_src>

<mosaic_0001>
module attributes {stable_mosaic.version = 11 : i64} {
  func.func @kernel(%arg0: i32, %arg1: memref<128x128xbf16, #tpu.memory_space<vmem>>, %arg2: memref<128x128xf32, #tpu.memory_space<vmem>>, %arg3: memref<128x128xf32, #tpu.memory_space<vmem>>, %arg4: memref<128x2xf32, #tpu.memory_space<vmem>>, %arg5: memref<128x128xf32, #tpu.memory_space<vmem>>) attributes {dimension_semantics = [#tpu.dimension_semantics<arbitrary>], iteration_bounds = array<i64: 1>, scalar_prefetch = 0 : i64, scratch_operands = 0 : i64, tpu.core_type = #tpu.core_type<tc>, window_params = [{pipeline_mode = #tpu.pipeline_mode<synchronous>, transform_indices = @transform_0, window_bounds = array<i64: 128, 128>}, {pipeline_mode = #tpu.pipeline_mode<synchronous>, transform_indices = @transform_1, window_bounds = array<i64: 128, 128>}, {pipeline_mode = #tpu.pipeline_mode<synchronous>, transform_indices = @transform_2, window_bounds = array<i64: 128, 128>}, {pipeline_mode = #tpu.pipeline_mode<synchronous>, transform_indices = @transform_3, window_bounds = array<i64: 128, 2>}, {pipeline_mode = #tpu.pipeline_mode<synchronous>, transform_indices = @transform_4, window_bounds = array<i64: 128, 128>}]} {
    %c0 = arith.constant 0 : index
    %c0_0 = arith.constant 0 : index
    %0 = vector.load %arg1[%c0, %c0_0] : memref<128x128xbf16, #tpu.memory_space<vmem>>, vector<128x128xbf16>
    %c0_1 = arith.constant 0 : index
    %c0_2 = arith.constant 0 : index
    %1 = vector.load %arg2[%c0_1, %c0_2] : memref<128x128xf32, #tpu.memory_space<vmem>>, vector<128x128xf32>
    %c0_3 = arith.constant 0 : index
    %c0_4 = arith.constant 0 : index
    %2 = vector.load %arg3[%c0_3, %c0_4] : memref<128x128xf32, #tpu.memory_space<vmem>>, vector<128x128xf32>
    %c0_5 = arith.constant 0 : index
    %c0_6 = arith.constant 0 : index
    %3 = vector.load %arg4[%c0_5, %c0_6] : memref<128x2xf32, #tpu.memory_space<vmem>>, vector<128x2xf32>
    %4 = vector.extract_strided_slice %3 {offsets = [0, 0], sizes = [128, 1], strides = [1, 1]} : vector<128x2xf32> to vector<128x1xf32>
    %5 = vector.extract_strided_slice %3 {offsets = [0, 1], sizes = [128, 1], strides = [1, 1]} : vector<128x2xf32> to vector<128x1xf32>
    %6 = vector.broadcast %4 : vector<128x1xf32> to vector<128x128xf32>
    %7 = arith.mulf %1, %6 : vector<128x128xf32>
    %8 = arith.truncf %1 : vector<128x128xf32> to vector<128x128xbf16>
    %cst = arith.constant dense<0.000000e+00> : vector<128x128xf32>
    %9 = tpu.matmul %0, %8, %cst {dimension_numbers = #tpu.dot_dimension_numbers<[1], [0], [0], [1], [0, 0, 1, 1], [], []>} : vector<128x128xbf16>, vector<128x128xbf16>, vector<128x128xf32> -> vector<128x128xf32>
    %cst_7 = arith.constant 0.000000e+00 : f32
    %10 = vector.broadcast %cst_7 : f32 to vector<128x128xf32>
    %11 = arith.maximumf %9, %10 : vector<128x128xf32>
    %12 = arith.mulf %11, %2 : vector<128x128xf32>
    %13 = arith.addf %7, %12 : vector<128x128xf32>
    %14 = arith.truncf %12 : vector<128x128xf32> to vector<128x128xbf16>
    %cst_8 = arith.constant dense<0.000000e+00> : vector<128x128xf32>
    %15 = tpu.matmul %0, %14, %cst_8 {dimension_numbers = #tpu.dot_dimension_numbers<[1], [0], [0], [1], [0, 0, 1, 1], [], []>} : vector<128x128xbf16>, vector<128x128xbf16>, vector<128x128xf32> -> vector<128x128xf32>
    %cst_9 = arith.constant 0.000000e+00 : f32
    %16 = vector.broadcast %cst_9 : f32 to vector<128x128xf32>
    %17 = arith.maximumf %15, %16 : vector<128x128xf32>
    %18 = arith.mulf %17, %2 : vector<128x128xf32>
    %19 = arith.addf %13, %18 : vector<128x128xf32>
    %20 = vector.broadcast %5 : vector<128x1xf32> to vector<128x128xf32>
    %21 = arith.mulf %19, %20 : vector<128x128xf32>
    %c0_10 = arith.constant 0 : index
    %c0_11 = arith.constant 0 : index
    %22 = vector.load %arg5[%c0_10, %c0_11] : memref<128x128xf32, #tpu.memory_space<vmem>>, vector<128x128xf32>
    tpu.vector_store %arg5[%c0_10, %c0_11], %21 {strides = array<i32>} : memref<128x128xf32, #tpu.memory_space<vmem>>, vector<128x128xf32>,
    return
  }
  func.func @transform_0(%arg0: i32) -> (i32, i32) {
    %c0_i32 = arith.constant 0 : i32
    %c0_i32_0 = arith.constant 0 : i32
    %c0_i32_1 = arith.constant 0 : i32
    return %c0_i32, %c0_i32_0 : i32, i32
  }
  func.func @transform_1(%arg0: i32) -> (i32, i32) {
    %c0_i32 = arith.constant 0 : i32
    %c0_i32_0 = arith.constant 0 : i32
    %c0_i32_1 = arith.constant 0 : i32
    return %c0_i32, %c0_i32_0 : i32, i32
  }
  func.func @transform_2(%arg0: i32) -> (i32, i32) {
    %c0_i32 = arith.constant 0 : i32
    %c0_i32_0 = arith.constant 0 : i32
    %c0_i32_1 = arith.constant 0 : i32
    return %c0_i32, %c0_i32_0 : i32, i32
  }
  func.func @transform_3(%arg0: i32) -> (i32, i32) {
    %c0_i32 = arith.constant 0 : i32
    %c0_i32_0 = arith.constant 0 : i32
    %c0_i32_1 = arith.constant 0 : i32
    return %c0_i32, %c0_i32_0 : i32, i32
  }
  func.func @transform_4(%arg0: i32) -> (i32, i32) {
    %c0_i32 = arith.constant 0 : i32
    %c0_i32_0 = arith.constant 0 : i32
    %c0_i32_1 = arith.constant 0 : i32
    return %c0_i32, %c0_i32_0 : i32, i32
  }
}

</mosaic_0001>

<bundles_post_ra>
// kernel: tpu_custom_call.1
= control target key start
LH: loop header
LB: loop body
LE: loop exit
PB: predicated region body
PF: predicated region fallthrough
CT: control target
= control target key end

     0   :  { %9 = vsyncpa [#allocation3], 0  ;;  %s1299_s0 = inlined_call_operand.hbm [shape: bf16[128,128], index: 0, kind: input, shape index: {}]   ;;  %s1300_s1 = inlined_call_operand.vmem [shape: f32[128,128], index: 1, kind: input, shape index: {}]   ;;  %s1301_s2 = inlined_call_operand.hbm [shape: f32[128,128], index: 2, kind: input, shape index: {}]   ;;  %s1302_s3 = inlined_call_operand.vmem [shape: f32[128,2], index: 3, kind: input, shape index: {}]   ;;  %s1303_s4 = inlined_call_operand.hbm [shape: f32[128,128], index: 4, kind: output, shape index: {}]  }
   0x1   :  { %10 = vsyncpa [#allocation6], 0 }
   0x2   :  { %11 = vsyncpa [#allocation4], 0  ;;  %s872_s15 = smov [#allocation2]   ;;  %s800_s19 = scalar_lea.hbm %s1299_s0, 1024 }
   0x3   :  { %s17_s16 = sshll.u32 %s872_s15, 4  ;;  %p801_p0 = scmp.ne.s32.totalorder %s1299_s0, %s800_s19  ;;  %s18_s16 = int_to_ptr.vmem [resolvable:$true] %s17_s16 }
   0x4   :  { %p804_p1 = scmp.lt.u32.totalorder %s800_s19, %s1299_s0 }
   0x6   :  { %p806_p2 = pnand %p804_p1, %p801_p0 }
   0x8   :  { %809 = shalt.err (!%p806_p2)
}
   0x9   :  { %s810_s24 = scalar_lea.vmem %s18_s16, 1024  ;;  %p815_p4 = scmp.lt.s32.totalorder %s18_s16, %s18_s16 }
   0xa   :  { %p811_p3 = scmp.ne.s32.totalorder %s18_s16, %s810_s24  ;;  %p816_p5 = scmp.lt.s32.totalorder %s810_s24, %s810_s24 }
   0xc   :  { %p817_p6 = por %p816_p5, %p815_p4 }
   0xe   :  { %p818_p7 = pnand %p817_p6, %p811_p3 }
  0x10   :  { %821 = shalt.err (!%p818_p7)
}
  0x11   :  { %s873_s25 = smov 64   ;;  %s874_s26 = smov 4  }
  0x12   :  { %23 = dma.hbm_to_vmem [thread:$0]  %s1299_s0, 1024, %s18_s16, [#allocation3], %s873_s25, %s873_s25, %s874_s26  }
  0x13   :  { %s875_s29 = smov [#allocation5]   ;;  %s822_s7 = scalar_lea.hbm %s1301_s2, 2048 }
  0x14   :  { %s31_s30 = sshll.u32 %s875_s29, 4  ;;  %p823_p8 = scmp.ne.s32.totalorder %s1301_s2, %s822_s7  ;;  %s32_s30 = int_to_ptr.vmem [resolvable:$true] %s31_s30 }
  0x15   :  { %p826_p9 = scmp.lt.u32.totalorder %s822_s7, %s1301_s2 }
  0x17   :  { %p828_p10 = pnand %p826_p9, %p823_p8 }
  0x19   :  { %831 = shalt.err (!%p828_p10)
}
  0x1a   :  { %s832_s12 = scalar_lea.vmem %s32_s30, 2048  ;;  %p837_p12 = scmp.lt.s32.totalorder %s32_s30, %s32_s30 }
  0x1b   :  { %p833_p11 = scmp.ne.s32.totalorder %s32_s30, %s832_s12  ;;  %p838_p13 = scmp.lt.s32.totalorder %s832_s12, %s832_s12 }
  0x1d   :  { %p839_p0 = por %p838_p13, %p837_p12 }
  0x1f   :  { %p840_p1 = pnand %p839_p0, %p833_p11 }
  0x21   :  { %843 = shalt.err (!%p840_p1)
}
  0x22   :  { %s876_s0 = smov 128   ;;  %s877_s13 = smov 8  }
  0x23   :  { %37 = dma.hbm_to_vmem [thread:$0]  %s1301_s2, 2048, %s32_s30, [#allocation6], %s876_s0, %s876_s0, %s877_s13  }
  0x24   :  { %866 = dma.done.wait [#allocation3], 1024  }
  0x25   :  { %867 = vsyncadd [#allocation3], 4294966272 }
  0x26   :  { %868 = dma.done.wait [#allocation6], 2048  }
  0x27   :  { %869 = vsyncadd [#allocation6], 4294965248  ;;  %v878_v0 = vmov 0   ;;  %v936_v1 = vld [vmem:[%s1300_s1] sm:$0xff]  ;;  %v941_v2 = vld [vmem:[%s1300_s1 + $0x8] sm:$0xff]  ;;  %v879_v49 = vmov 1  }
  0x28   :  { %788 = vset.pattern.permute.xlu0 %v878_v0  ;;  %789 = vset.pattern.permute.xlu1 %v878_v0  ;;  %v946_v3 = vld [vmem:[%s1300_s1 + $0x10] sm:$0xff]  ;;  %v207_v4 = vpack.c.bf16 %v941_v2, %v936_v1  ;;  %v953_v5 = vld [vmem:[%s1300_s1 + $0x18] sm:$0xff]  ;;  %v960_v7 = vld [vmem:[%s1300_s1 + $0x20] sm:$0xff] }
  0x29   :  { %v208_v6 = vpack.c.bf16 %v953_v5, %v946_v3  ;;  %v965_v8 = vld [vmem:[%s1300_s1 + $0x28] sm:$0xff]  ;;  %v970_v9 = vld [vmem:[%s1300_s1 + $0x30] sm:$0xff]  ;;  %v977_v11 = vld [vmem:[%s1300_s1 + $0x38] sm:$0xff] }
  0x2a   :  { %715 = vmatprep.subr.bf16.mxu0 %v207_v4  ;;  %v209_v10 = vpack.c.bf16 %v965_v8, %v960_v7  ;;  %v792_v12 = vld [vmem:[#allocation2] sm:$0xff]   ;;  %v210_v13 = vpack.c.bf16 %v977_v11, %v970_v9  ;;  %v989_v15 = vld [vmem:[%s1300_s1 + $0x48] sm:$0xff]  ;;  %v1001_v18 = vld [vmem:[%s1302_s3 + $0x10] sm:$0xff] }
  0x2b   :  { %716 = vmatpush3.bf16.msra.mxu0 %v207_v4  ;;  %731 = vmatprep.mubr.bf16.mxu0 %v792_v12  ;;  %v984_v14 = vld [vmem:[%s1300_s1 + $0x40] sm:$0xff]  ;;  %v1006_v19 = vld [vmem:[%s1300_s1 + $0x50] sm:$0xff]  ;;  %v1011_v20 = vld [vmem:[%s1300_s1 + $0x58] sm:$0xff] }
  0x2c   :  { %717 = vmatprep.subr.bf16.mxu0 %v208_v6  ;;  %763 = vmatprep.mubr.bf16.mxu1 %v792_v12  ;;  %v211_v16 = vpack.c.bf16 %v989_v15, %v984_v14  ;;  %v996_v17 = vld [vmem:[%s1302_s3] sm:$0xff]  ;;  %v96_v21 = vld [vmem:[%s1302_s3 + $0x8] sm:$0xff]  ;;  %v98_v22 = vld [vmem:[%s1302_s3 + $0x18] sm:$0xff]  ;;  %v212_v23 = vpack.c.bf16 %v1011_v20, %v1006_v19 }
  0x2d   :  { %113 = vperm.xlu0 %788, %v996_v17   ;;  %123 = vperm.xlu1 %789, %v1001_v18   ;;  %v1026_v24 = vld [vmem:[%s1300_s1 + $0x60] sm:$0xff]  ;;  %v1031_v25 = vld [vmem:[%s1300_s1 + $0x68] sm:$0xff]  ;;  %v1044_v29 = vld [vmem:[%s1300_s1 + $0x70] sm:$0xff] }
  0x2e   :  { %1318 = vst [vmem:[#allocation11_spill] sm:$0xff] %v1026_v24  ;;  %1319 = vst [vmem:[#allocation12_spill] sm:$0xff] %v1031_v25  ;;  %v99_v26 = vld [vmem:[%s1302_s3 + $0x20] sm:$0xff]  ;;  %v100_v27 = vld [vmem:[%s1302_s3 + $0x28] sm:$0xff]  ;;  %v213_v28 = vpack.c.bf16 %v1031_v25, %v1026_v24 }
  0x2f   :  { %718 = vmatpush3.bf16.msra.mxu0 %v208_v6  ;;  %1320 = vst [vmem:[#allocation13_spill] sm:$0xff] %v1044_v29  ;;  %v1049_v30 = vld [vmem:[%s1300_s1 + $0x78] sm:$0xff]  ;;  %v101_v31 = vld [vmem:[%s1302_s3 + $0x30] sm:$0xff]  ;;  %v103_v34 = vld [vmem:[%s1302_s3 + $0x40] sm:$0xff] }
  0x30   :  { %719 = vmatprep.subr.bf16.mxu0 %v209_v10  ;;  %1321 = vst [vmem:[#allocation14_spill] sm:$0xff] %v1049_v30  ;;  %v102_v32 = vld [vmem:[%s1302_s3 + $0x38] sm:$0xff]  ;;  %v214_v33 = vpack.c.bf16 %v1049_v30, %v1044_v29  ;;  %v104_v35 = vld [vmem:[%s1302_s3 + $0x48] sm:$0xff]  ;;  %v105_v37 = vld [vmem:[%s1302_s3 + $0x50] sm:$0xff] }
  0x31   :  { %118 = vperm.xlu0 %788, %v96_v21   ;;  %128 = vperm.xlu1 %789, %v98_v22   ;;  %v1065_v36 = vld [vmem:[#allocation2 + $0x8] sm:$0xff]   ;;  %v106_v38 = vld [vmem:[%s1302_s3 + $0x58] sm:$0xff]  ;;  %v1073_v39 = vld [vmem:[#allocation2 + $0x10] sm:$0xff]  }
  0x32   :  { %v107_v40 = vld [vmem:[%s1302_s3 + $0x60] sm:$0xff]  ;;  %v108_v41 = vld [vmem:[%s1302_s3 + $0x68] sm:$0xff]  ;;  %v1083_v42 = vld [vmem:[#allocation2 + $0x18] sm:$0xff]  }
  0x33   :  { %720 = vmatpush3.bf16.msra.mxu0 %v209_v10  ;;  %v109_v43 = vld [vmem:[%s1302_s3 + $0x70] sm:$0xff]  ;;  %v110_v44 = vld [vmem:[%s1302_s3 + $0x78] sm:$0xff]  ;;  %v1091_v45 = vld [vmem:[#allocation2 + $0x20] sm:$0xff]   ;;  %s880_s3 = smov [#allocation7]  }
  0x34   :  { %721 = vmatprep.subr.bf16.mxu0 %v210_v13  ;;  %v1095_v46 = vld [vmem:[#allocation2 + $0x28] sm:$0xff]   ;;  %v1097_v47 = vld [vmem:[#allocation2 + $0x30] sm:$0xff]   ;;  %v1101_v48 = vld [vmem:[#allocation2 + $0x38] sm:$0xff]   ;;  %s662_s26 = sshll.u32 %s880_s3, 4  ;;  %s663_s26 = int_to_ptr.vmem [resolvable:$true] %s662_s26 }
  0x35   :  { %133 = vperm.xlu0 %788, %v99_v26   ;;  %138 = vperm.xlu1 %789, %v100_v27   ;;  %v1106_v53 = vld [vmem:[#allocation5 + $0x10] sm:$0xff]  ;;  %v1108_v55 = vld [vmem:[#allocation5 + $0x18] sm:$0xff]  ;;  %v1110_v57 = vld [vmem:[#allocation5] sm:$0xff]  ;;  %s844_s27 = scalar_lea.vmem %s663_s26, 2048  ;;  %p849_p3 = scmp.lt.s32.totalorder %s663_s26, %s663_s26 }
  0x36   :  { %v1112_v59 = vld [vmem:[#allocation5 + $0x8] sm:$0xff]  ;;  %p845_p2 = scmp.ne.s32.totalorder %s663_s26, %s844_s27  ;;  %p850_p4 = scmp.lt.s32.totalorder %s844_s27, %s844_s27 }
  0x37   :  { %722 = vmatpush3.bf16.msra.mxu0 %v210_v13 }
  0x38   :  { %723 = vmatprep.subr.bf16.mxu0 %v211_v16  ;;  %p851_p5 = por %p850_p4, %p849_p3 }
  0x39   :  { %143 = vperm.xlu0 %788, %v101_v31   ;;  %148 = vperm.xlu1 %789, %v102_v32  }
  0x3a   :  { %p852_p6 = pnand %p851_p5, %p845_p2 }
  0x3b   :  { %724 = vmatpush3.bf16.msra.mxu0 %v211_v16 }
  0x3c   :  { %725 = vmatprep.subr.bf16.mxu0 %v212_v23 }
  0x3d   :  { %153 = vperm.xlu0 %788, %v103_v34   ;;  %158 = vperm.xlu1 %789, %v104_v35  }
  0x3f   :  { %726 = vmatpush3.bf16.msra.mxu0 %v212_v23  ;;  %v1134_v23 = vld [vmem:[#allocation5 + $0x20] sm:$0xff] }
  0x40   :  { %727 = vmatprep.subr.bf16.mxu0 %v213_v28 }
  0x41   :  { %163 = vperm.xlu0 %788, %v105_v37   ;;  %168 = vperm.xlu1 %789, %v106_v38  }
  0x43   :  { %728 = vmatpush3.bf16.msra.mxu0 %v213_v28 }
  0x44   :  { %729 = vmatprep.subr.bf16.mxu0 %v214_v33 }
  0x45   :  { %173 = vperm.xlu0 %788, %v107_v40   ;;  %178 = vperm.xlu1 %789, %v108_v41  }
  0x47   :  { %730 = vmatpush3.bf16.msra.mxu0 %v214_v33 }
  0x49   :  { %183 = vperm.xlu0 %788, %v109_v43   ;;  %188 = vperm.xlu1 %789, %v110_v44  }
  0x4a   :  { %732 = vmatmul.mubr.bf16.vlgmr.msra.gmra.mrb[0].mxu0 %v1065_v36 }
  0x4b   :  { %735 = vmatprep.mubr.bf16.mxu0 %v1073_v39 }
  0x4d   :  { %791 = vset.pattern.permute.xlu1 %v879_v49  ;;  %790 = vset.pattern.permute.xlu0 %v879_v49 }
  0x4e   :  { %566 = vperm.xlu1 %791, %v96_v21   ;;  %562 = vperm.xlu0 %790, %v996_v17   ;;  %v1130_v17 = vld [vmem:[#allocation5 + $0x30] sm:$0xff]  ;;  %v1132_v21 = vld [vmem:[#allocation5 + $0x38] sm:$0xff] }
  0x52   :  { %736 = vmatmul.mubr.bf16.gmra.mrb[4].mxu0 %v1083_v42  ;;  %570 = vperm.xlu1 %791, %v1001_v18  }
  0x53   :  { %739 = vmatprep.mubr.bf16.mxu0 %v1091_v45  ;;  %574 = vperm.xlu0 %790, %v98_v22  }
  0x56   :  { %578 = vperm.xlu1 %791, %v99_v26  }
  0x57   :  { %582 = vperm.xlu0 %790, %v100_v27   ;;  %v1136_v27 = vld [vmem:[#allocation5 + $0x28] sm:$0xff] }
  0x5a   :  { %740 = vmatmul.mubr.bf16.gmra.mrb[8].mxu0 %v1095_v46  ;;  %586 = vperm.xlu1 %791, %v101_v31  }
  0x5b   :  { %743 = vmatprep.mubr.bf16.mxu0 %v1097_v47  ;;  %590 = vperm.xlu0 %790, %v102_v32  }
  0x5e   :  { %594 = vperm.xlu1 %791, %v103_v34  }
  0x5f   :  { %598 = vperm.xlu0 %790, %v104_v35  }
  0x62   :  { %744 = vmatmul.mubr.bf16.gmra.mrb[12].mxu0 %v1101_v48  ;;  %602 = vperm.xlu1 %791, %v105_v37  }
  0x63   :  { %606 = vperm.xlu0 %790, %v106_v38  }
  0x66   :  { %610 = vperm.xlu1 %791, %v107_v40  }
  0x67   :  { %614 = vperm.xlu0 %790, %v108_v41  }
  0x6a   :  { %618 = vperm.xlu1 %791, %v109_v43  }
  0x6b   :  { %622 = vperm.xlu0 %790, %v110_v44   ;;  %v1154_v44 = vld [vmem:[#allocation5 + $0x50] sm:$0xff] }
 0x11d   :  { %v733_v50 = vpop.f32.mrb[0].mxu0 }
 0x11e   :  { %v362_v51 = vmax.f32 %v733_v50, 0.0  ;;  %v297_v52 = vpop.f32.mrb[1].mxu0  ;;  %v1156_v50 = vld [vmem:[#allocation5 + $0x58] sm:$0xff] }
 0x11f   :  { %v360_v54 = vmax.f32 %v297_v52, 0.0  ;;  %v734_v56 = vpop.f32.mrb[2].mxu0  ;;  %v1158_v52 = vld [vmem:[#allocation5 + $0x40] sm:$0xff] }
 0x120   :  { %v363_v58 = vmax.f32 %v734_v56, 0.0  ;;  %v300_v60 = vpop.f32.mrb[3].mxu0  ;;  %v1115_v62 = vmul.f32 %v362_v51, %v1106_v53  ;;  %v1160_v56 = vld [vmem:[#allocation5 + $0x48] sm:$0xff] }
 0x121   :  { %v361_v61 = vmax.f32 %v300_v60, 0.0  ;;  %v1121_v0 = vmul.f32 %v360_v54, %v1110_v57  ;;  %1322 = vst [vmem:[#allocation15_spill] sm:$0xff] %v1160_v56 }
 0x122   :  { %v1118_v63 = vmul.f32 %v363_v58, %v1108_v55 }
 0x123   :  { %v1124_v4 = vmul.f32 %v361_v61, %v1112_v59 }
 0x124   :  { %v409_v6 = vpack.c.bf16 %v1118_v63, %v1115_v62 }
 0x125   :  { %v737_v10 = vpop.f32.mrb[4].mxu0  ;;  %v408_v12 = vpack.c.bf16 %v1124_v4, %v1121_v0 }
 0x126   :  { %v366_v13 = vmax.f32 %v737_v10, 0.0  ;;  %v313_v16 = vpop.f32.mrb[5].mxu0 }
 0x127   :  { %v364_v18 = vmax.f32 %v313_v16, 0.0  ;;  %v738_v22 = vpop.f32.mrb[6].mxu0  ;;  %747 = vmatprep.subr.bf16.mxu1 %v408_v12 }
 0x128   :  { %v367_v26 = vmax.f32 %v738_v22, 0.0  ;;  %v316_v28 = vpop.f32.mrb[7].mxu0  ;;  %748 = vmatpush3.bf16.msra.mxu1 %v408_v12  ;;  %v1139_v32 = vmul.f32 %v366_v13, %v1130_v17 }
 0x129   :  { %v365_v31 = vmax.f32 %v316_v28, 0.0  ;;  %749 = vmatprep.subr.bf16.mxu1 %v409_v6  ;;  %v1145_v34 = vmul.f32 %v364_v18, %v1134_v23  ;;  %v1178_v28 = vld [vmem:[#allocation5 + $0x70] sm:$0xff] }
 0x12a   :  { %v1142_v33 = vmul.f32 %v367_v26, %v1132_v21  ;;  %1324 = vst [vmem:[#allocation17_spill] sm:$0xff] %v1178_v28 }
 0x12b   :  { %v1148_v35 = vmul.f32 %v365_v31, %v1136_v27 }
 0x12c   :  { %750 = vmatpush3.bf16.msra.mxu1 %v409_v6  ;;  %v411_v37 = vpack.c.bf16 %v1142_v33, %v1139_v32 }
 0x12d   :  { %v741_v38 = vpop.f32.mrb[8].mxu0  ;;  %v410_v40 = vpack.c.bf16 %v1148_v35, %v1145_v34 }
 0x12e   :  { %v370_v41 = vmax.f32 %v741_v38, 0.0  ;;  %v329_v43 = vpop.f32.mrb[9].mxu0  ;;  %v1180_v38 = vld [vmem:[#allocation5 + $0x78] sm:$0xff] }
 0x12f   :  { %v368_v49 = vmax.f32 %v329_v43, 0.0  ;;  %v742_v51 = vpop.f32.mrb[10].mxu0  ;;  %751 = vmatprep.subr.bf16.mxu1 %v410_v40  ;;  %1325 = vst [vmem:[#allocation18_spill] sm:$0xff] %v1180_v38 }
 0x130   :  { %v371_v54 = vmax.f32 %v742_v51, 0.0  ;;  %v332_v58 = vpop.f32.mrb[11].mxu0  ;;  %752 = vmatpush3.bf16.msra.mxu1 %v410_v40  ;;  %v1163_v61 = vmul.f32 %v370_v41, %v1154_v44  ;;  %v1182_v41 = vld [vmem:[#allocation5 + $0x60] sm:$0xff] }
 0x131   :  { %v369_v60 = vmax.f32 %v332_v58, 0.0  ;;  %753 = vmatprep.subr.bf16.mxu1 %v411_v37  ;;  %v1169_v10 = vmul.f32 %v368_v49, %v1158_v52  ;;  %1326 = vst [vmem:[#allocation19_spill] sm:$0xff] %v1182_v41 }
 0x132   :  { %v1166_v6 = vmul.f32 %v371_v54, %v1156_v50 }
 0x133   :  { %v1172_v12 = vmul.f32 %v369_v60, %v1160_v56 }
 0x134   :  { %754 = vmatpush3.bf16.msra.mxu1 %v411_v37  ;;  %v413_v13 = vpack.c.bf16 %v1166_v6, %v1163_v61  ;;  %v1184_v37 = vld [vmem:[#allocation5 + $0x68] sm:$0xff] }
 0x135   :  { %1323 = vst [vmem:[#allocation16_spill] sm:$0xff] %v1172_v12  ;;  %v745_v16 = vpop.f32.mrb[12].mxu0  ;;  %v412_v18 = vpack.c.bf16 %v1172_v12, %v1169_v10  ;;  %1327 = vst [vmem:[#allocation20_spill] sm:$0xff] %v1184_v37 }
 0x136   :  { %v374_v22 = vmax.f32 %v745_v16, 0.0  ;;  %v345_v26 = vpop.f32.mrb[13].mxu0 }
 0x137   :  { %v372_v31 = vmax.f32 %v345_v26, 0.0  ;;  %v746_v40 = vpop.f32.mrb[14].mxu0  ;;  %755 = vmatprep.subr.bf16.mxu1 %v412_v18 }
 0x138   :  { %v375_v43 = vmax.f32 %v746_v40, 0.0  ;;  %v348_v49 = vpop.f32.mrb[15].mxu0  ;;  %756 = vmatpush3.bf16.msra.mxu1 %v412_v18  ;;  %v1187_v54 = vmul.f32 %v374_v22, %v1178_v28  ;;  %v114_v22 = vpop.permute.xlu0 %113 }
 0x139   :  { %v373_v51 = vmax.f32 %v348_v49, 0.0  ;;  %757 = vmatprep.subr.bf16.mxu1 %v413_v13  ;;  %v1193_v60 = vmul.f32 %v372_v31, %v1182_v41 }
 0x13a   :  { %1328 = vst [vmem:[#allocation21_spill] sm:$0xff] %v1187_v54  ;;  %v1190_v58 = vmul.f32 %v375_v43, %v1180_v38 }
 0x13b   :  { %1330 = vst [vmem:[#allocation23_spill] sm:$0xff] %v1193_v60  ;;  %v1196_v16 = vmul.f32 %v373_v51, %v1184_v37 }
 0x13c   :  { %1329 = vst [vmem:[#allocation22_spill] sm:$0xff] %v1190_v58  ;;  %758 = vmatpush3.bf16.msra.mxu1 %v413_v13  ;;  %v415_v26 = vpack.c.bf16 %v1190_v58, %v1187_v54  ;;  %v124_v13 = vpop.permute.xlu1 %123  ;;  %v119_v40 = vpop.permute.xlu0 %118 }
 0x13d   :  { %1331 = vst [vmem:[#allocation24_spill] sm:$0xff] %v1196_v16  ;;  %v414_v18 = vpack.c.bf16 %v1196_v16, %v1193_v60  ;;  %v193_v41 = vmul.f32 %v124_v13, %v946_v3  ;;  %v191_v60 = vmul.f32 %v114_v22, %v936_v1 }
 0x13f   :  { %759 = vmatprep.subr.bf16.mxu1 %v414_v18  ;;  %v394_v29 = vadd.f32 %v1115_v62, %v193_v41  ;;  %v392_v1 = vadd.f32 %v1121_v0, %v191_v60 }
 0x140   :  { %760 = vmatpush3.bf16.msra.mxu1 %v414_v18  ;;  %v129_v31 = vpop.permute.xlu1 %128  ;;  %v134_v49 = vpop.permute.xlu0 %133 }
 0x141   :  { %761 = vmatprep.subr.bf16.mxu1 %v415_v26  ;;  %v194_v25 = vmul.f32 %v129_v31, %v953_v5  ;;  %v195_v0 = vmul.f32 %v134_v49, %v960_v7 }
 0x143   :  { %v395_v5 = vadd.f32 %v1118_v63, %v194_v25  ;;  %v396_v49 = vadd.f32 %v1145_v34, %v195_v0 }
 0x144   :  { %762 = vmatpush3.bf16.msra.mxu1 %v415_v26  ;;  %v139_v43 = vpop.permute.xlu1 %138 }
 0x147   :  { %764 = vmatmul.mubr.bf16.vlgmr.msra.gmra.mrb[0].mxu1 %v1065_v36  ;;  %v144_v36 = vpop.permute.xlu0 %143 }
 0x148   :  { %767 = vmatprep.mubr.bf16.mxu1 %v1073_v39  ;;  %v149_v51 = vpop.permute.xlu1 %148 }
 0x149   :  { %v198_v25 = vmul.f32 %v149_v51, %v977_v11 }
 0x14b   :  { %v1211_v39 = vpop.permute.xlu0 %153 }
 0x14c   :  { %v1209_v26 = vpop.permute.xlu1 %158 }
 0x14f   :  { %768 = vmatmul.mubr.bf16.gmra.mrb[4].mxu1 %v1083_v42 }
 0x150   :  { %771 = vmatprep.mubr.bf16.mxu1 %v1091_v45  ;;  %v1213_v42 = vpop.permute.xlu1 %168  ;;  %v1215_v45 = vpop.permute.xlu0 %163 }
 0x157   :  { %772 = vmatmul.mubr.bf16.gmra.mrb[8].mxu1 %v1095_v46  ;;  %v1217_v46 = vpop.permute.xlu1 %178 }
 0x158   :  { %775 = vmatprep.mubr.bf16.mxu1 %v1097_v47  ;;  %1332 = vst [vmem:[#allocation25_spill] sm:$0xff] %v1217_v46  ;;  %v1219_v47 = vpop.permute.xlu0 %173 }
 0x159   :  { %1333 = vst [vmem:[#allocation26_spill] sm:$0xff] %v1219_v47  ;;  %v192_v47 = vmul.f32 %v119_v40, %v941_v2 }
 0x15b   :  { %v393_v31 = vadd.f32 %v1124_v4, %v192_v47  ;;  %v196_v4 = vmul.f32 %v139_v43, %v965_v8  ;;  %v399_v8 = vadd.f32 %v1142_v33, %v198_v25 }
 0x15c   :  { %v1223_v18 = vpop.permute.xlu0 %183 }
 0x15d   :  { %1335 = vst [vmem:[#allocation28_spill] sm:$0xff] %v1223_v18 }
 0x15f   :  { %776 = vmatmul.mubr.bf16.gmra.mrb[12].mxu1 %v1101_v48  ;;  %v1221_v48 = vpop.permute.xlu1 %188 }
 0x160   :  { %1334 = vst [vmem:[#allocation27_spill] sm:$0xff] %v1221_v48  ;;  %v563_v16 = vpop.permute.xlu0 %562  ;;  %v1341_v25 = vld [vmem:[#allocation26_spill] sm:$0xff] }
 0x163   :  { %v567_v37 = vpop.permute.xlu1 %566 }
 0x164   :  { %v575_v58 = vpop.permute.xlu0 %574 }
 0x167   :  { %v571_v38 = vpop.permute.xlu1 %570 }
 0x168   :  { %v1229_v24 = vpop.permute.xlu0 %582 }
 0x16b   :  { %v579_v28 = vpop.permute.xlu1 %578 }
 0x16c   :  { %v591_v60 = vpop.permute.xlu0 %590 }
 0x16f   :  { %v587_v40 = vpop.permute.xlu1 %586 }
 0x173   :  { %v595_v11 = vpop.permute.xlu1 %594 }
 0x21a   :  { %v765_v54 = vpop.f32.mrb[0].mxu1 }
 0x21b   :  { %v515_v30 = vmax.f32 %v765_v54, 0.0  ;;  %v450_v46 = vpop.f32.mrb[1].mxu1 }
 0x21c   :  { %v513_v48 = vmax.f32 %v450_v46, 0.0  ;;  %v766_v18 = vpop.f32.mrb[2].mxu1 }
 0x21d   :  { %v531_v56 = vmul.f32 %v515_v30, %v1106_v53  ;;  %v516_v12 = vmax.f32 %v766_v18, 0.0  ;;  %v453_v3 = vpop.f32.mrb[3].mxu1  ;;  %v197_v30 = vmul.f32 %v144_v36, %v970_v9  ;;  %v397_v36 = vadd.f32 %v1148_v35, %v196_v4  ;;  %v1342_v4 = vld [vmem:[#allocation14_spill] sm:$0xff] }
 0x21e   :  { %v529_v13 = vmul.f32 %v513_v48, %v1110_v57  ;;  %v514_v22 = vmax.f32 %v453_v3, 0.0  ;;  %v201_v3 = vmul.f32 %v1215_v45, %v1006_v19 }
 0x21f   :  { %v547_v54 = vadd.f32 %v531_v56, %v394_v29  ;;  %v532_v2 = vmul.f32 %v516_v12, %v1108_v55  ;;  %v398_v12 = vadd.f32 %v1139_v32, %v197_v30  ;;  %v599_v32 = vpop.permute.xlu0 %598  ;;  %v1336_v30 = vld [vmem:[#allocation16_spill] sm:$0xff] }
 0x220   :  { %v545_v46 = vadd.f32 %v529_v13, %v392_v1  ;;  %v530_v62 = vmul.f32 %v514_v22, %v1112_v59 }
 0x221   :  { %v627_v53 = vmul.f32 %v571_v38, %v547_v54  ;;  %v548_v41 = vadd.f32 %v532_v2, %v395_v5  ;;  %v603_v2 = vpop.permute.xlu1 %602 }
 0x222   :  { %v625_v57 = vmul.f32 %v563_v16, %v545_v46  ;;  %v546_v48 = vadd.f32 %v530_v62, %v393_v31  ;;  %v769_v18 = vpop.f32.mrb[4].mxu1 }
 0x223   :  { %643 = vst [vmem:[#allocation7 + $0x10] sm:$0xff] %v627_v53  ;;  %v628_v29 = vmul.f32 %v575_v58, %v548_v41  ;;  %v519_v55 = vmax.f32 %v769_v18, 0.0  ;;  %v466_v63 = vpop.f32.mrb[5].mxu1  ;;  %v1337_v41 = vld [vmem:[#allocation15_spill] sm:$0xff] }
 0x224   :  { %641 = vst [vmem:[#allocation7] sm:$0xff] %v625_v57  ;;  %v626_v59 = vmul.f32 %v567_v37, %v546_v48  ;;  %v517_v56 = vmax.f32 %v466_v63, 0.0  ;;  %v770_v9 = vpop.f32.mrb[6].mxu1  ;;  %v1340_v18 = vld [vmem:[#allocation11_spill] sm:$0xff] }
 0x225   :  { %644 = vst [vmem:[#allocation7 + $0x18] sm:$0xff] %v628_v29  ;;  %v535_v7 = vmul.f32 %v519_v55, %v1130_v17  ;;  %v520_v38 = vmax.f32 %v770_v9, 0.0  ;;  %v469_v16 = vpop.f32.mrb[7].mxu1  ;;  %v203_v29 = vmul.f32 %v1341_v25, %v1340_v18 }
 0x226   :  { %642 = vst [vmem:[#allocation7 + $0x8] sm:$0xff] %v626_v59  ;;  %v533_v58 = vmul.f32 %v517_v56, %v1134_v23  ;;  %v518_v51 = vmax.f32 %v469_v16, 0.0  ;;  %v199_v23 = vmul.f32 %v1211_v39, %v984_v14  ;;  %v402_v14 = vadd.f32 %v1163_v61, %v201_v3  ;;  %v1343_v59 = vld [vmem:[#allocation27_spill] sm:$0xff] }
 0x227   :  { %v551_v43 = vadd.f32 %v535_v7, %v398_v12  ;;  %v536_v37 = vmul.f32 %v520_v38, %v1132_v21  ;;  %v202_v21 = vmul.f32 %v1213_v42, %v1011_v20  ;;  %v1344_v7 = vld [vmem:[#allocation12_spill] sm:$0xff]  ;;  %v1345_v38 = vld [vmem:[#allocation25_spill] sm:$0xff]  ;;  %v1348_v3 = vld [vmem:[#allocation23_spill] sm:$0xff] }
 0x228   :  { %v549_v47 = vadd.f32 %v533_v58, %v396_v49  ;;  %v534_v17 = vmul.f32 %v518_v51, %v1136_v27  ;;  %v200_v27 = vmul.f32 %v1209_v26, %v989_v15  ;;  %v400_v42 = vadd.f32 %v1169_v10, %v199_v23 }
 0x229   :  { %v631_v34 = vmul.f32 %v587_v40, %v551_v43  ;;  %v552_v1 = vadd.f32 %v536_v37, %v399_v8  ;;  %v607_v40 = vpop.permute.xlu0 %606  ;;  %v403_v26 = vadd.f32 %v1166_v6, %v202_v21  ;;  %v204_v16 = vmul.f32 %v1345_v38, %v1344_v7  ;;  %v1346_v43 = vld [vmem:[#allocation21_spill] sm:$0xff] }
 0x22a   :  { %v629_v13 = vmul.f32 %v579_v28, %v549_v47  ;;  %v550_v22 = vadd.f32 %v534_v17, %v397_v36  ;;  %v773_v33 = vpop.f32.mrb[8].mxu1  ;;  %v401_v53 = vadd.f32 %v1336_v30, %v200_v27 }
 0x22b   :  { %647 = vst [vmem:[#allocation7 + $0x30] sm:$0xff] %v631_v34  ;;  %v632_v35 = vmul.f32 %v591_v60, %v552_v1  ;;  %v523_v5 = vmax.f32 %v773_v33, 0.0  ;;  %v482_v54 = vpop.f32.mrb[9].mxu1  ;;  %v1339_v60 = vld [vmem:[#allocation28_spill] sm:$0xff]  ;;  %v404_v34 = vadd.f32 %v1348_v3, %v203_v29  ;;  %v1349_v1 = vld [vmem:[#allocation19_spill] sm:$0xff] }
 0x22c   :  { %645 = vst [vmem:[#allocation7 + $0x20] sm:$0xff] %v629_v13  ;;  %v630_v19 = vmul.f32 %v1229_v24, %v550_v22  ;;  %v521_v45 = vmax.f32 %v482_v54, 0.0  ;;  %v774_v31 = vpop.f32.mrb[10].mxu1  ;;  %v1350_v22 = vld [vmem:[#allocation22_spill] sm:$0xff] }
 0x22d   :  { %648 = vst [vmem:[#allocation7 + $0x38] sm:$0xff] %v632_v35  ;;  %v539_v28 = vmul.f32 %v523_v5, %v1154_v44  ;;  %v524_v39 = vmax.f32 %v774_v31, 0.0  ;;  %v485_v20 = vpop.f32.mrb[11].mxu1  ;;  %v1338_v44 = vld [vmem:[#allocation13_spill] sm:$0xff]  ;;  %v615_v49 = vpop.permute.xlu0 %614  ;;  %v1351_v35 = vld [vmem:[#allocation18_spill] sm:$0xff]  ;;  %v1352_v5 = vld [vmem:[#allocation24_spill] sm:$0xff] }
 0x22e   :  { %646 = vst [vmem:[#allocation7 + $0x28] sm:$0xff] %v630_v19  ;;  %v537_v46 = vmul.f32 %v521_v45, %v1158_v52  ;;  %v522_v15 = vmax.f32 %v485_v20, 0.0  ;;  %v205_v57 = vmul.f32 %v1339_v60, %v1338_v44  ;;  %v611_v52 = vpop.permute.xlu1 %610  ;;  %v405_v54 = vadd.f32 %v1352_v5, %v204_v16  ;;  %v1353_v19 = vld [vmem:[#allocation20_spill] sm:$0xff] }
 0x22f   :  { %v555_v62 = vadd.f32 %v539_v28, %v402_v14  ;;  %v540_v24 = vmul.f32 %v524_v39, %v1156_v50  ;;  %v206_v50 = vmul.f32 %v1343_v59, %v1342_v4 }
 0x230   :  { %v553_v61 = vadd.f32 %v537_v46, %v400_v42  ;;  %v538_v0 = vmul.f32 %v522_v15, %v1337_v41  ;;  %v406_v37 = vadd.f32 %v1346_v43, %v205_v57 }
 0x231   :  { %v635_v48 = vmul.f32 %v603_v2, %v555_v62  ;;  %v556_v10 = vadd.f32 %v540_v24, %v403_v26  ;;  %v407_v33 = vadd.f32 %v1350_v22, %v206_v50  ;;  %v623_v28 = vpop.permute.xlu0 %622 }
 0x232   :  { %v633_v55 = vmul.f32 %v595_v11, %v553_v61  ;;  %v554_v63 = vadd.f32 %v538_v0, %v401_v53  ;;  %v777_v6 = vpop.f32.mrb[12].mxu1  ;;  %v1347_v11 = vld [vmem:[#allocation17_spill] sm:$0xff]  ;;  %v619_v27 = vpop.permute.xlu1 %618 }
 0x233   :  { %651 = vst [vmem:[#allocation7 + $0x50] sm:$0xff] %v635_v48  ;;  %v636_v56 = vmul.f32 %v607_v40, %v556_v10  ;;  %v527_v9 = vmax.f32 %v777_v6, 0.0  ;;  %v498_v12 = vpop.f32.mrb[13].mxu1 }
 0x234   :  { %649 = vst [vmem:[#allocation7 + $0x40] sm:$0xff] %v633_v55  ;;  %v634_v58 = vmul.f32 %v599_v32, %v554_v63  ;;  %v525_v51 = vmax.f32 %v498_v12, 0.0  ;;  %v778_v8 = vpop.f32.mrb[14].mxu1 }
 0x235   :  { %652 = vst [vmem:[#allocation7 + $0x58] sm:$0xff] %v636_v56  ;;  %v543_v36 = vmul.f32 %v527_v9, %v1347_v11  ;;  %v528_v47 = vmax.f32 %v778_v8, 0.0  ;;  %v501_v17 = vpop.f32.mrb[15].mxu1 }
 0x236   :  { %650 = vst [vmem:[#allocation7 + $0x48] sm:$0xff] %v634_v58  ;;  %v541_v23 = vmul.f32 %v525_v51, %v1349_v1  ;;  %v526_v13 = vmax.f32 %v501_v17, 0.0 }
 0x237   :  { %v559_v21 = vadd.f32 %v543_v36, %v406_v37  ;;  %v544_v32 = vmul.f32 %v528_v47, %v1351_v35 }
 0x238   :  { %v557_v2 = vadd.f32 %v541_v23, %v404_v34  ;;  %v542_v45 = vmul.f32 %v526_v13, %v1353_v19 }
 0x239   :  { %v639_v31 = vmul.f32 %v619_v27, %v559_v21  ;;  %v560_v14 = vadd.f32 %v544_v32, %v407_v33 }
 0x23a   :  { %v637_v39 = vmul.f32 %v611_v52, %v557_v2  ;;  %v558_v20 = vadd.f32 %v542_v45, %v405_v54 }
 0x23b   :  { %655 = vst [vmem:[#allocation7 + $0x70] sm:$0xff] %v639_v31  ;;  %v640_v42 = vmul.f32 %v623_v28, %v560_v14 }
 0x23c   :  { %653 = vst [vmem:[#allocation7 + $0x60] sm:$0xff] %v637_v39  ;;  %v638_v40 = vmul.f32 %v615_v49, %v558_v20 }
 0x23d   :  { %656 = vst [vmem:[#allocation7 + $0x78] sm:$0xff] %v640_v42 }
 0x23e   :  { %654 = vst [vmem:[#allocation7 + $0x68] sm:$0xff] %v638_v40 }
 0x23f   :  { %855 = shalt.err (!%p852_p6)
}
 0x240   :  { %s856_s30 = scalar_lea.hbm %s1303_s4, 2048 }
 0x241   :  { %p857_p7 = scmp.ne.s32.totalorder %s1303_s4, %s856_s30  ;;  %p860_p8 = scmp.lt.u32.totalorder %s856_s30, %s1303_s4 }
 0x243   :  { %p862_p9 = pnand %p860_p8, %p857_p7 }
 0x245   :  { %865 = shalt.err (!%p862_p9)
}
 0x246   :  { %668 = dma.vmem_to_hbm [thread:$0]  %s663_s26, 2048, %s1303_s4, [#allocation4], %s876_s0, %s876_s0, %s877_s13  }
 0x247   :  { %870 = dma.done.wait [#allocation4], 2048  }
 0x248   :  { %871 = vsyncadd [#allocation4], 4294965248 }
 0x249   :  { %672 = vsyncpa [#allocation3], 1 }
 0x24a   :  { %673 = vsyncpa [#allocation6], 1 }
 0x24b   :  { %674 = vsyncpa [#allocation4], 1 }

</bundles_post_ra>
